<compile_context>
chip_gen: v5e
topology: v5e:2x2
jax: 0.10.0
libtpu: 0.0.40
codegen_flags: <defaults>
</compile_context>

<pallas_src>
import functools

import jax
import jax.numpy as jnp
from jax.experimental import pallas as pl
from jax.experimental.pallas import tpu as pltpu

_LANES = 128
_SUBLANES = 8
_NUM_SUBLANE = 0   # num partial read back from sublane 0
_DEN_SUBLANE = 4   # den partial read back from sublane 4


def _reward_criterion_kernel(inp_ref, seq_ref, rew_ref, out_ref, *,
                             total_rows, row_block, ragged):
    inp = inp_ref[...].astype(jnp.float32)   # (TB, T) log-prob of sampled word
    rew = rew_ref[...].astype(jnp.float32)   # (TB, T) per-token reward
    seq = seq_ref[...]                       # (TB, T) sampled word indices (int)

    # mask_t = (seq_t > 0), shifted right by one along T with a leading 1.
    mask = (seq > 0).astype(jnp.float32)
    rolled = pltpu.roll(mask, shift=1, axis=1)                       # mask[:, t-1] at t
    col = jax.lax.broadcasted_iota(jnp.int32, mask.shape, dimension=1)
    shifted = jnp.where(col == 0, jnp.float32(1.0), rolled)          # column 0 -> 1

    contrib = -inp * rew * shifted
    m = shifted

    if ragged:
        # Only the last block can hold rows past `total_rows`; those rows carry
        # undefined (possibly NaN) data.  A select (not multiply) keeps the sums
        # NaN-safe.  Statically skipped when B % row_block == 0.
        i = pl.program_id(0)
        last = pl.num_programs(0) - 1
        limit = jnp.where(i == last, total_rows - last * row_block, row_block)
        row = jax.lax.broadcasted_iota(jnp.int32, mask.shape, dimension=0)
        valid = row < limit
        contrib = jnp.where(valid, contrib, jnp.float32(0.0))
        m = jnp.where(valid, m, jnp.float32(0.0))

    num = jnp.sum(contrib)
    den = jnp.sum(m)

    # One packed, lane-dense (1, 8, 128) tile per step: num in sublanes 0-3,
    # den in sublanes 4-7.
    sub = jax.lax.broadcasted_iota(jnp.int32, (_SUBLANES, _LANES), dimension=0)
    out_ref[...] = jnp.where(sub < _DEN_SUBLANE, num, den)[None].astype(jnp.float32)


def _row_alignment(*dtypes):
    """Packed-sublane row alignment: 8 for 32-bit, 16 for bf16, 32 for int8."""
    return max(max(32 // jnp.dtype(d).itemsize for d in dtypes), _SUBLANES)


def _tpu_vmem_bytes():
    try:
        info = pltpu.get_tpu_info()
        return int(getattr(info, "vmem_capacity_bytes", 64 << 20))
    except Exception:
        return 64 << 20   # conservative (treat like v7x)


def _pick_row_block(batch, bytes_per_row, align, target_block_bytes):
    """Largest aligned row block targeting ~target_block_bytes of combined input."""
    rows = (target_block_bytes // max(bytes_per_row, 1)) // align * align
    rows = max(rows, align)
    if rows >= batch:
        total_bytes = batch * bytes_per_row
        # Whole batch fits in one block.  If the stream is non-trivial, split it
        # into >= 2 blocks so the parallel grid can use both TCs on v7x.
        if total_bytes > (4 << 20) and batch >= 2 * align:
            half = -(-batch // 2)                    # cdiv(batch, 2)
            return (-(-half // align)) * align       # round up to alignment
        return batch                                 # single full-extent block
    return int(rows)


def reward_criterion(inp, seq, reward, *, row_block=None):
    """inp: (B,T) f32/bf16, seq: (B,T) int, reward: (B,T) f32/bf16 -> scalar f32.

    Tip (biggest lever): pass inp/reward as bf16 and seq as int8 if the producer
    allows -- the kernel upcasts internally and the stream is HBM-read-bound.
    """
    B, T = inp.shape
    bytes_per_row = T * (inp.dtype.itemsize + seq.dtype.itemsize + reward.dtype.itemsize)
    align = _row_alignment(inp.dtype, seq.dtype, reward.dtype)

    phys_vmem = _tpu_vmem_bytes()
    small_vmem = phys_vmem <= (64 << 20)
    target_block_bytes = (12 << 20) if small_vmem else (20 << 20)

    if row_block is None:
        row_block = _pick_row_block(B, bytes_per_row, align, target_block_bytes)
    if row_block < B:
        assert row_block % align == 0, (
            f"row_block must be a multiple of {align} for these dtypes when tiling")
    grid = pl.cdiv(B, row_block)
    ragged = (B % row_block) != 0

    # Double-buffered input footprint + output tiles + slack; gen-specific cap.
    block_bytes = row_block * bytes_per_row
    vmem_cap = (48 << 20) if small_vmem else (64 << 20)
    vmem_limit = int(min(max(2 * block_bytes + (4 << 20), 16 << 20), vmem_cap))

    kernel = functools.partial(
        _reward_criterion_kernel,
        total_rows=B, row_block=row_block, ragged=ragged)

    partials = pl.pallas_call(
        kernel,
        grid=(grid,),
        out_shape=jax.ShapeDtypeStruct((grid, _SUBLANES, _LANES), jnp.float32),
        in_specs=[
            pl.BlockSpec((row_block, T), lambda i: (i, 0)),
            pl.BlockSpec((row_block, T), lambda i: (i, 0)),
            pl.BlockSpec((row_block, T), lambda i: (i, 0)),
        ],
        out_specs=pl.BlockSpec((1, _SUBLANES, _LANES), lambda i: (i, 0, 0)),
        compiler_params=pltpu.CompilerParams(
            dimension_semantics=("parallel",),
            vmem_limit_bytes=vmem_limit,
        ),
    )(inp, seq, reward)

    num = jnp.sum(partials[:, _NUM_SUBLANE, 0])
    den = jnp.sum(partials[:, _DEN_SUBLANE, 0])
    return num / den


def _reference(inp, seq, reward):
    mask = (seq > 0).astype(jnp.float32)
    mask = jnp.concatenate(
        [jnp.ones((mask.shape[0], 1), jnp.float32), mask[:, :-1]], axis=1)
    out = -inp.astype(jnp.float32) * reward.astype(jnp.float32) * mask
    return jnp.sum(out) / jnp.sum(mask)


if __name__ == "__main__":
    key = jax.random.PRNGKey(0)
    k1, k2, k3 = jax.random.split(key, 3)

    # Case 1: small shapes matching the module (single-block path).
    B, T = 2, 8
    inp = -jnp.abs(jax.random.normal(k1, (B, T), dtype=jnp.float32))
    seq = jax.random.randint(k2, (B, T), minval=0, maxval=5, dtype=jnp.int32)
    reward = jax.random.normal(k3, (B, T), dtype=jnp.float32)

    out = jax.block_until_ready(reward_criterion(inp, seq, reward))
    ref = jax.block_until_ready(_reference(inp, seq, reward))
    assert jnp.allclose(out, ref, atol=1e-5, rtol=1e-5), (out, ref)

    # Case 2: exercises grid > 1 and a ragged (masked) last row-block.
    B2, T2 = 20, 16
    k4, k5, k6 = jax.random.split(jax.random.PRNGKey(1), 3)
    inp2 = -jnp.abs(jax.random.normal(k4, (B2, T2), dtype=jnp.float32))
    seq2 = jax.random.randint(k5, (B2, T2), minval=0, maxval=3, dtype=jnp.int32)
    rew2 = jax.random.normal(k6, (B2, T2), dtype=jnp.float32)

    out2 = jax.block_until_ready(reward_criterion(inp2, rew2 * 0 + seq2.astype(jnp.float32) * 0 + seq2 if False else seq2, rew2) if False else reward_criterion(inp2, seq2, rew2, row_block=8))
    ref2 = jax.block_until_ready(_reference(inp2, seq2, rew2))
    assert jnp.allclose(out2, ref2, atol=1e-5, rtol=1e-5), (out2, ref2)

    # Case 3: bf16 inp/reward (the recommended reduced-bandwidth calling mode).
    inp3 = inp.astype(jnp.bfloat16)
    rew3 = reward.astype(jnp.bfloat16)
    out3 = jax.block_until_ready(reward_criterion(inp3, seq, rew3))
    ref3 = jax.block_until_ready(_reference(inp3, seq, rew3))
    assert jnp.allclose(out3, ref3, atol=1e-2, rtol=1e-2), (out3, ref3)

    print("KERNEL_OK")
</pallas_src>

<mosaic_0001>
module attributes {stable_mosaic.version = 11 : i64} {
  func.func @_reward_criterion_kernel(%arg0: i32, %arg1: memref<2x8xf32, #tpu.memory_space<vmem>>, %arg2: memref<2x8xi32, #tpu.memory_space<vmem>>, %arg3: memref<2x8xf32, #tpu.memory_space<vmem>>, %arg4: memref<1x8x128xf32, #tpu.memory_space<vmem>>) attributes {dimension_semantics = [#tpu.dimension_semantics<parallel>], iteration_bounds = array<i64: 1>, scalar_prefetch = 0 : i64, scratch_operands = 0 : i64, tpu.core_type = #tpu.core_type<tc>, window_params = [{transform_indices = @transform_0, window_bounds = array<i64: 2, 8>}, {transform_indices = @transform_1, window_bounds = array<i64: 2, 8>}, {transform_indices = @transform_2, window_bounds = array<i64: 2, 8>}, {transform_indices = @transform_3, window_bounds = array<i64: 1, 8, 128>}]} {
    %c0 = arith.constant 0 : index
    %c0_0 = arith.constant 0 : index
    %0 = vector.load %arg1[%c0, %c0_0] : memref<2x8xf32, #tpu.memory_space<vmem>>, vector<2x8xf32>
    %c0_1 = arith.constant 0 : index
    %c0_2 = arith.constant 0 : index
    %1 = vector.load %arg3[%c0_1, %c0_2] : memref<2x8xf32, #tpu.memory_space<vmem>>, vector<2x8xf32>
    %c0_3 = arith.constant 0 : index
    %c0_4 = arith.constant 0 : index
    %2 = vector.load %arg2[%c0_3, %c0_4] : memref<2x8xi32, #tpu.memory_space<vmem>>, vector<2x8xi32>
    %c0_i32 = arith.constant 0 : i32
    %3 = vector.broadcast %c0_i32 : i32 to vector<2x8xi32>
    %4 = arith.cmpi sgt, %2, %3 : vector<2x8xi32>
    %5 = arith.extui %4 : vector<2x8xi1> to vector<2x8xi32>
    %6 = arith.sitofp %5 : vector<2x8xi32> to vector<2x8xf32>
    %c1_i32 = arith.constant 1 : i32
    %7 = tpu.dynamic_rotate %6 by %c1_i32 dim 1 : vector<2x8xf32>, i32 -> vector<2x8xf32>
    %8 = tpu.iota {dimensions = array<i32: 1>} : vector<2x8xi32>
    %c0_i32_5 = arith.constant 0 : i32
    %9 = vector.broadcast %c0_i32_5 : i32 to vector<2x8xi32>
    %10 = arith.cmpi eq, %8, %9 : vector<2x8xi32>
    %cst = arith.constant 1.000000e+00 : f32
    %11 = vector.broadcast %cst : f32 to vector<2x8xf32>
    %12 = arith.select %10, %11, %7 : vector<2x8xi1>, vector<2x8xf32>
    %cst_6 = arith.constant 0.000000e+00 : f32
    %13 = vector.broadcast %cst_6 : f32 to vector<2x8xf32>
    %14 = arith.subf %13, %0 : vector<2x8xf32>
    %15 = arith.mulf %14, %1 : vector<2x8xf32>
    %16 = arith.mulf %15, %12 : vector<2x8xf32>
    %17 = vector.shape_cast %16 : vector<2x8xf32> to vector<1x2x8xf32>
    %cst_7 = arith.constant dense<0.000000e+00> : vector<1xf32>
    %18 = vector.multi_reduction <add>, %17, %cst_7 [1, 2] : vector<1x2x8xf32> to vector<1xf32>
    %19 = vector.shape_cast %18 : vector<1xf32> to vector<1x1x1xf32>
    %20 = vector.extract %19[0, 0, 0] : f32 from vector<1x1x1xf32>
    %21 = vector.shape_cast %12 : vector<2x8xf32> to vector<1x2x8xf32>
    %cst_8 = arith.constant dense<0.000000e+00> : vector<1xf32>
    %22 = vector.multi_reduction <add>, %21, %cst_8 [1, 2] : vector<1x2x8xf32> to vector<1xf32>
    %23 = vector.shape_cast %22 : vector<1xf32> to vector<1x1x1xf32>
    %24 = vector.extract %23[0, 0, 0] : f32 from vector<1x1x1xf32>
    %25 = tpu.iota {dimensions = array<i32: 0>} : vector<8x128xi32>
    %c4_i32 = arith.constant 4 : i32
    %26 = vector.broadcast %c4_i32 : i32 to vector<8x128xi32>
    %27 = arith.cmpi slt, %25, %26 : vector<8x128xi32>
    %28 = vector.broadcast %20 : f32 to vector<8x128xf32>
    %29 = vector.broadcast %24 : f32 to vector<8x128xf32>
    %30 = arith.select %27, %28, %29 : vector<8x128xi1>, vector<8x128xf32>
    %31 = vector.shape_cast %30 : vector<8x128xf32> to vector<1x8x128xf32>
    %c0_9 = arith.constant 0 : index
    %c0_10 = arith.constant 0 : index
    %c0_11 = arith.constant 0 : index
    %32 = vector.load %arg4[%c0_9, %c0_10, %c0_11] : memref<1x8x128xf32, #tpu.memory_space<vmem>>, vector<1x8x128xf32>
    tpu.vector_store %arg4[%c0_9, %c0_10, %c0_11], %31 {strides = array<i32>} : memref<1x8x128xf32, #tpu.memory_space<vmem>>, vector<1x8x128xf32>,
    return
  }
  func.func @transform_0(%arg0: i32) -> (i32, i32) {
    %c0_i32 = arith.constant 0 : i32
    %c0_i32_0 = arith.constant 0 : i32
    return %arg0, %c0_i32 : i32, i32
  }
  func.func @transform_1(%arg0: i32) -> (i32, i32) {
    %c0_i32 = arith.constant 0 : i32
    %c0_i32_0 = arith.constant 0 : i32
    return %arg0, %c0_i32 : i32, i32
  }
  func.func @transform_2(%arg0: i32) -> (i32, i32) {
    %c0_i32 = arith.constant 0 : i32
    %c0_i32_0 = arith.constant 0 : i32
    return %arg0, %c0_i32 : i32, i32
  }
  func.func @transform_3(%arg0: i32) -> (i32, i32, i32) {
    %c0_i32 = arith.constant 0 : i32
    %c0_i32_0 = arith.constant 0 : i32
    %c0_i32_1 = arith.constant 0 : i32
    return %arg0, %c0_i32, %c0_i32_0 : i32, i32, i32
  }
}

</mosaic_0001>

<bundles_post_ra>
// kernel: tpu_custom_call.1
= control target key start
LH: loop header
LB: loop body
LE: loop exit
PB: predicated region body
PF: predicated region fallthrough
CT: control target
= control target key end

     0   :  { %8 = vsyncpa [#allocation3], 0  ;;  %s279_s0 = inlined_call_operand.hbm [shape: f32[2,8], index: 0, kind: input, shape index: {}]   ;;  %s280_s1 = inlined_call_operand.hbm [shape: s32[2,8], index: 1, kind: input, shape index: {}]   ;;  %s281_s2 = inlined_call_operand.hbm [shape: f32[2,8], index: 2, kind: input, shape index: {}]   ;;  %s282_s3 = inlined_call_operand.hbm [shape: f32[1,8,128], index: 3, kind: output, shape index: {}]  }
   0x1   :  { %9 = vsyncpa [#allocation6], 0  ;;  %s27_s14 = sshll.u32 %s280_s1, 4  ;;  %s28_s14 = int_to_ptr.hbm [resolvable:$true] %s27_s14 }
   0x2   :  { %10 = vsyncpa [#allocation4], 0  ;;  %s240_s15 = smov [#allocation5]   ;;  %s16_s19 = sshll.u32 %s279_s0, 4  ;;  %s17_s19 = int_to_ptr.hbm [resolvable:$true] %s16_s19 }
   0x3   :  { %s29_s16 = sshll.u32 %s240_s15, 4  ;;  %s241_s20 = smov [#allocation2]   ;;  %s30_s16 = int_to_ptr.vmem [resolvable:$true] %s29_s16 }
   0x4   :  { %32 = dma.hbm_to_vmem [thread:$0]  %s28_s14, 32, %s30_s16, [#allocation6]  }
   0x5   :  { %s18_s21 = sshll.u32 %s241_s20, 4  ;;  %s38_s24 = sshll.u32 %s281_s2, 4  ;;  %s19_s21 = int_to_ptr.vmem [resolvable:$true] %s18_s21  ;;  %s39_s24 = int_to_ptr.hbm [resolvable:$true] %s38_s24 }
   0x6   :  { %21 = dma.hbm_to_vmem [thread:$0]  %s17_s19, 32, %s19_s21, [#allocation3]  }
   0x7   :  { %s242_s1 = smov [#allocation7]  }
   0x8   :  { %s40_s25 = sshll.u32 %s242_s1, 4  ;;  %s41_s25 = int_to_ptr.vmem [resolvable:$true] %s40_s25 }
   0x9   :  { %43 = dma.hbm_to_vmem [thread:$0]  %s39_s24, 32, %s41_s25, [#allocation6]  }
   0xa   :  { %234 = dma.done.wait [#allocation3], 32  }
   0xb   :  { %235 = vsyncadd [#allocation3], 4294967264 }
   0xc   :  { %236 = dma.done.wait [#allocation6], 64  }
   0xd   :  { %237 = vsyncadd [#allocation6], 4294967232  ;;  %v58_v0 = vld [vmem:[#allocation5] sm:$0x3]  ;;  %v243_v1 = vmov 0.0   ;;  %s244_s0 = smov 8   ;;  %v69_v7 = vlaneseq }
   0xe   :  { %vm59_vm0 = vcmp.gt.s32.totalorder %v58_v0, 0  ;;  %vm62_vm1 = vcmask 1047616   ;;  %s245_s2 = smov 121   ;;  %v56_v8 = vld [vmem:[#allocation2] sm:$0x3]  ;;  %vm80_vm3 = vcmask 58368  }
   0xf   :  { %v126_v2 = vsel %vm59_vm0, 1.0, %v243_v1  ;;  %v70_v9 = vand.u32 127, %v69_v7  ;;  %v77_v10 = vsub.f32 0.0, %v56_v8  ;;  %v57_v11 = vld [vmem:[#allocation7] sm:$0x3]  ;;  %v102_v32 = vshrl.u32 %v69_v7, 7 }
  0x10   :  { %63 = vrot.lane.b32.xlu0 %v126_v2, %s244_s0  ;;  %s246_s26 = smov [#allocation8]   ;;  %s115_s30 = sshll.u32 %s282_s3, 4  ;;  %s116_s30 = int_to_ptr.hbm [resolvable:$true] %s115_s30 }
  0x11   :  { %vm71_vm2 = vcmp.eq.s32.totalorder %v70_v9, 0  ;;  %v78_v12 = vmul.f32 %v77_v10, %v57_v11  ;;  %s113_s27 = sshll.u32 %s246_s26, 4  ;;  %vm103_vm4 = vcmp.lt.s32.totalorder %v102_v32, 4  ;;  %s114_s27 = int_to_ptr.vmem [resolvable:$true] %s113_s27 }
  0x82   :  { %v64_v3 = vpop.permute.xlu0 %63 }
  0x83   :  { %v65_v4 = vsel %vm62_vm1, %v64_v3, %v126_v2 }
  0x84   :  { %66 = vrot.lane.b32.xlu0 %v65_v4, %s244_s0 }
  0xf6   :  { %v67_v5 = vpop.permute.xlu0 %66 }
  0xf7   :  { %v68_v6 = vsel %vm62_vm1, %v67_v5, %v126_v2 }
  0xf8   :  { %73 = vrot.lane.b32.xlu1 %v68_v6, %s245_s2 }
 0x16a   :  { %v74_v13 = vpop.permute.xlu1 %73 }
 0x16b   :  { %v76_v14 = vsel %vm71_vm2, 1.0, %v74_v13 }
 0x16c   :  { %v79_v15 = vmul.f32 %v78_v12, %v76_v14  ;;  %v91_v16 = vsel %vm80_vm3, %v76_v14, 0.0 }
 0x16d   :  { %92 = vadd.xlane.f32.xlu2 %v91_v16 }
 0x16e   :  { %v81_v17 = vsel %vm80_vm3, %v79_v15, 0.0 }
 0x16f   :  { %82 = vadd.xlane.f32.xlu1 %v81_v17 }
 0x1e0   :  { %v93_v18 = vpop.xlane.xlu2 %92 }
 0x1e1   :  { %v94_v19 = vrot.slane %v93_v18, 4 }
 0x1e2   :  { %v83_v20 = vpop.xlane.xlu1 %82 }
 0x1e3   :  { %v95_v21 = vadd.f32 %v94_v19, %v93_v18  ;;  %v84_v22 = vrot.slane %v83_v20, 4 }
 0x1e5   :  { %v96_v23 = vrot.slane %v95_v21, 2  ;;  %v85_v24 = vadd.f32 %v84_v22, %v83_v20 }
 0x1e7   :  { %v97_v25 = vadd.f32 %v96_v23, %v95_v21  ;;  %v86_v26 = vrot.slane %v85_v24, 2 }
 0x1e9   :  { %v87_v27 = vadd.f32 %v86_v26, %v85_v24  ;;  %v98_v28 = vrot.slane %v97_v25, 1 }
 0x1eb   :  { %v88_v29 = vrot.slane %v87_v27, 1  ;;  %v99_v31 = vadd.f32 %v98_v28, %v97_v25 }
 0x1ed   :  { %v89_v30 = vadd.f32 %v88_v29, %v87_v27 }
 0x1ef   :  { %127 = vpush %v89_v30 }
 0x1f0   :  { %129 = vpush %v99_v31 }
 0x220   :  { %s128_s4 = spop %127 }
 0x221   :  { %v104_v33 = vstv %s128_s4  ;;  %s130_s5 = spop %129 }
 0x222   :  { %v105_v34 = vstv %s130_s5 }
 0x223   :  { %v106_v35 = vsel %vm103_vm4, %v104_v33, %v105_v34 }
 0x224   :  { %107 = vst [vmem:[#allocation8] sm:$0xff] %v106_v35 }
 0x225   :  { %118 = dma.vmem_to_hbm [thread:$0]  %s114_s27, 128, %s116_s30, [#allocation4]  }
 0x226   :  { %238 = dma.done.wait [#allocation4], 128  }
 0x227   :  { %239 = vsyncadd [#allocation4], 4294967168 }
 0x228   :  { %123 = vsyncpa [#allocation3], 1 }
 0x229   :  { %124 = vsyncpa [#allocation6], 1 }
 0x22a   :  { %125 = vsyncpa [#allocation4], 1 }

</bundles_post_ra>
